<compile_context>
chip_gen: v7x
topology: tpu7x:2x2x1
jax: 0.10.0
libtpu: 0.0.40
codegen_flags: <defaults>
</compile_context>

<pallas_src>
import jax
import jax.numpy as jnp
from jax.experimental import pallas as pl
from jax.experimental.pallas import tpu as pltpu


# ----------------------------------------------------------------------------
# Pallas kernel: embedding gather + LSTM cell step + additive attention +
# per-segment softmax + context + output projection.  Single grid point,
# full-array blocks (everything fits comfortably in VMEM at these sizes).
# ----------------------------------------------------------------------------
def decoder_kernel(ids_ref, emb_ref, h_ref, c_ref, enc_ref,
                   w_gates_ref, wa_ref, v_ref, w_out_ref, bias_ref,
                   logits_ref, h_out_ref, c_out_ref, attn_out_ref):
    B, H = h_ref.shape
    S = enc_ref.shape[0] // B
    O = logits_ref.shape[-1]

    # ---- encoder-side half of the attention energy -------------------------
    # Independent of this step's LSTM state, so it is issued FIRST and
    # overlaps the LSTM gate matmuls / sigmoid-tanh chain.
    enc = enc_ref[...]                                   # (B*S, H) batch-major
    wa_e = wa_ref[H:2 * H, :]                            # (H, H)  encoder half
    b_attn = bias_ref[1:2, 0:H]                          # (1, H)
    enc_part = (jnp.dot(enc, wa_e, preferred_element_type=jnp.float32)
                + b_attn)                                # (B*S, H)

    # ---- embedding gather (B tiny: static unroll, dynamic row slices) ------
    x = jnp.concatenate(
        [emb_ref[pl.ds(ids_ref[b], 1), :] for b in range(B)], axis=0)  # (B, H)

    h = h_ref[...]                                       # (B, H)
    c = c_ref[...]                                       # (B, H)

    # ---- single LSTM step (PyTorch gate order i,f,g,o), accumulating dots --
    w_ih_t = w_gates_ref[0:H, :]                         # (H, 4H)
    w_hh_t = w_gates_ref[H:2 * H, :]                     # (H, 4H)
    b_gates = bias_ref[0:1, :]                           # (1, 4H)
    gates = (jnp.dot(x, w_ih_t, preferred_element_type=jnp.float32)
             + jnp.dot(h, w_hh_t, preferred_element_type=jnp.float32)
             + b_gates)                                  # (B, 4H)
    i_g = jax.nn.sigmoid(gates[:, 0 * H:1 * H])
    f_g = jax.nn.sigmoid(gates[:, 1 * H:2 * H])
    g_g = jnp.tanh(gates[:, 2 * H:3 * H])
    o_g = jax.nn.sigmoid(gates[:, 3 * H:4 * H])
    c_new = f_g * c + i_g * g_g
    h_new = o_g * jnp.tanh(c_new)                        # lstm output (B, H)

    # ---- hidden-side half of the attention energy ---------------------------
    wa_h = wa_ref[0:H, :]                                # (H, H)  hidden half
    h_part = jnp.dot(h_new, wa_h, preferred_element_type=jnp.float32)  # (B, H)

    v_col = v_ref[...]                                   # (H, 1)

    # ---- per-batch-segment softmax + context (static unroll over tiny B) ----
    attn_cols = []
    ctx_rows = []
    for b in range(B):
        lo, hi = b * S, (b + 1) * S
        energy_b = jnp.tanh(enc_part[lo:hi, :] + h_part[b:b + 1, :])   # (S, H)
        sc_b = jnp.dot(energy_b, v_col,
                       preferred_element_type=jnp.float32)             # (S, 1)
        m_b = jnp.max(sc_b, axis=0, keepdims=True)                     # per-segment max
        e_b = jnp.exp(sc_b - m_b)
        a_b = e_b / jnp.sum(e_b, axis=0, keepdims=True)                # (S, 1)
        attn_cols.append(a_b)
        # context[b] = sum_s attn[b,s] * enc[b,s,:]  (VPU mul + sublane reduce)
        ctx_rows.append(jnp.sum(a_b * enc[lo:hi, :], axis=0, keepdims=True))

    context = jnp.concatenate(ctx_rows, axis=0)          # (B, H)
    attn_sb = jnp.concatenate(attn_cols, axis=1)         # (S, B) final layout

    # ---- output projection on cat([lstm_output, context]) -------------------
    w_out_h = w_out_ref[0:H, :]                          # (H, O)
    w_out_c = w_out_ref[H:2 * H, :]                      # (H, O)
    b_out = bias_ref[2:3, 0:O]                           # (1, O)
    logits = (jnp.dot(h_new, w_out_h, preferred_element_type=jnp.float32)
              + jnp.dot(context, w_out_c, preferred_element_type=jnp.float32)
              + b_out)                                   # (B, O)

    logits_ref[...] = logits
    h_out_ref[...] = h_new
    c_out_ref[...] = c_new
    attn_out_ref[...] = attn_sb


# ----------------------------------------------------------------------------
# Parameters (deterministic synthetic init, PyTorch-style shapes)
# ----------------------------------------------------------------------------
def init_params(key, hidden_size, output_size):
    H, O = hidden_size, output_size
    ks = jax.random.split(key, 10)
    n = lambda k, shape: 0.1 * jax.random.normal(k, shape, jnp.float32)
    return dict(
        embedding=n(ks[0], (O, H)),        # nn.Embedding(output_size, hidden_size)
        w_ih=n(ks[1], (4 * H, H)),         # nn.LSTM weight_ih_l0
        w_hh=n(ks[2], (4 * H, H)),         # nn.LSTM weight_hh_l0
        b_ih=n(ks[3], (4 * H,)),
        b_hh=n(ks[4], (4 * H,)),
        w_attn=n(ks[5], (H, 2 * H)),       # Attention.attn: Linear(2H, H)
        b_attn=n(ks[6], (H,)),
        v=n(ks[7], (1, H)),                # Attention.v: Linear(H, 1, bias=False)
        w_out=n(ks[8], (O, 2 * H)),        # intended out projection (see TODO above)
        b_out=n(ks[9], (O,)),
    )


# ----------------------------------------------------------------------------
# One-time prep (hoisted out of the per-step call)
# ----------------------------------------------------------------------------
def prepare_decoder_params(params):
    """Fuse / transpose / pack weights ONCE; the per-step call is pure pallas_call."""
    H = params['embedding'].shape[1]
    O = params['w_out'].shape[0]
    slab_w = max(4 * H, H, O)
    bias = jnp.zeros((3, slab_w), jnp.float32)
    bias = bias.at[0, :4 * H].set(params['b_ih'] + params['b_hh'])
    bias = bias.at[1, :H].set(params['b_attn'])
    bias = bias.at[2, :O].set(params['b_out'])
    return dict(
        embedding=params['embedding'],                                     # (O, H)
        w_gates=jnp.concatenate([params['w_ih'].T, params['w_hh'].T], 0),  # (2H, 4H)
        wa_t=params['w_attn'].T,                                           # (2H, H)
        v_col=params['v'].T,                                               # (H, 1)
        w_out_t=params['w_out'].T,                                         # (2H, O)
        bias=bias,                                                         # (3, slab_w)
    )


def prepare_encoder_outputs(encoder_outputs):
    """(S, B, H) -> batch-major flat (B*S, H) slab, row b*S + s.  Done once."""
    S, B, H = encoder_outputs.shape
    return jnp.transpose(encoder_outputs, (1, 0, 2)).reshape(B * S, H)


# ----------------------------------------------------------------------------
# Per-step forward: only the pallas_call (+ a free [None] reshape on h/c)
# ----------------------------------------------------------------------------
def decoder_step(prepped, input_ids, hidden, enc2d):
    h0, c0 = hidden
    h0 = h0[0]
    c0 = c0[0]
    B, H = h0.shape
    S = enc2d.shape[0] // B
    O = prepped['w_out_t'].shape[1]

    vmem = pl.BlockSpec(memory_space=pltpu.MemorySpace.VMEM)
    smem = pl.BlockSpec(memory_space=pltpu.MemorySpace.SMEM)

    logits, h_new, c_new, attn_sb = pl.pallas_call(
        decoder_kernel,
        out_shape=(
            jax.ShapeDtypeStruct((B, O), jnp.float32),
            jax.ShapeDtypeStruct((B, H), jnp.float32),
            jax.ShapeDtypeStruct((B, H), jnp.float32),
            jax.ShapeDtypeStruct((S, B), jnp.float32),   # final (S, B) layout
        ),
        in_specs=[smem] + [vmem] * 9,
        out_specs=(vmem, vmem, vmem, vmem),
    )(input_ids.astype(jnp.int32), prepped['embedding'], h0, c0, enc2d,
      prepped['w_gates'], prepped['wa_t'], prepped['v_col'],
      prepped['w_out_t'], prepped['bias'])

    return logits, (h_new[None], c_new[None]), attn_sb


# ----------------------------------------------------------------------------
# Pure-JAX reference (mirrors the PyTorch forward) for verification
# ----------------------------------------------------------------------------
def decoder_reference(params, input_ids, hidden, encoder_outputs):
    h0, c0 = hidden
    h0 = h0[0]
    c0 = c0[0]
    H = h0.shape[1]
    emb = params['embedding'][input_ids]
    gates = (emb @ params['w_ih'].T + params['b_ih']
             + h0 @ params['w_hh'].T + params['b_hh'])
    i_g = jax.nn.sigmoid(gates[:, :H])
    f_g = jax.nn.sigmoid(gates[:, H:2 * H])
    g_g = jnp.tanh(gates[:, 2 * H:3 * H])
    o_g = jax.nn.sigmoid(gates[:, 3 * H:])
    c_new = f_g * c0 + i_g * g_g
    h_new = o_g * jnp.tanh(c_new)

    S = encoder_outputs.shape[0]
    hidden_rep = jnp.broadcast_to(h_new[None], (S,) + h_new.shape)
    cat = jnp.concatenate([hidden_rep, encoder_outputs], axis=2)
    energy = jnp.tanh(cat @ params['w_attn'].T + params['b_attn'])
    attn = jnp.squeeze(energy @ params['v'].T, axis=2)            # (S, B)
    attn_w = jax.nn.softmax(attn, axis=0)
    context = jnp.einsum('sb,sbh->bh', attn_w, encoder_outputs)
    logits = (jnp.concatenate([h_new, context], axis=1) @ params['w_out'].T
              + params['b_out'])
    return logits, (h_new[None], c_new[None]), attn_w


if __name__ == "__main__":
    hidden_size, output_size = 32, 16
    B, S = 2, 8

    key = jax.random.PRNGKey(0)
    kp, ki, kh, kc, ke = jax.random.split(key, 5)
    params = init_params(kp, hidden_size, output_size)

    input_ids = jax.random.randint(ki, (B,), 0, output_size, dtype=jnp.int32)
    h0 = 0.1 * jax.random.normal(kh, (1, B, hidden_size), jnp.float32)
    c0 = 0.1 * jax.random.normal(kc, (1, B, hidden_size), jnp.float32)
    enc = 0.1 * jax.random.normal(ke, (S, B, hidden_size), jnp.float32)

    # one-time prep, hoisted off the per-step critical path
    prepped = jax.tree_util.tree_map(jnp.asarray, prepare_decoder_params(params))
    enc2d = prepare_encoder_outputs(enc)

    step = jax.jit(decoder_step)
    logits, (h1, c1), attn = step(prepped, input_ids, (h0, c0), enc2d)
    jax.block_until_ready((logits, h1, c1, attn))

    r_logits, (rh1, rc1), r_attn = decoder_reference(params, input_ids, (h0, c0), enc)
    assert jnp.max(jnp.abs(logits - r_logits)) < 1e-4, "logits mismatch"
    assert jnp.max(jnp.abs(h1 - rh1)) < 1e-4, "hidden state mismatch"
    assert jnp.max(jnp.abs(c1 - rc1)) < 1e-4, "cell state mismatch"
    assert jnp.max(jnp.abs(attn - r_attn)) < 1e-4, "attention weights mismatch"

    print("KERNEL_OK")
</pallas_src>

<mosaic_0001>
module attributes {stable_mosaic.version = 11 : i64} {
  func.func @decoder_kernel(%arg0: memref<2xi32, #tpu.memory_space<smem>>, %arg1: memref<16x32xf32, #tpu.memory_space<vmem>>, %arg2: memref<2x32xf32, #tpu.memory_space<vmem>>, %arg3: memref<2x32xf32, #tpu.memory_space<vmem>>, %arg4: memref<16x32xf32, #tpu.memory_space<vmem>>, %arg5: memref<64x128xf32, #tpu.memory_space<vmem>>, %arg6: memref<64x32xf32, #tpu.memory_space<vmem>>, %arg7: memref<32x1xf32, #tpu.memory_space<vmem>>, %arg8: memref<64x16xf32, #tpu.memory_space<vmem>>, %arg9: memref<3x128xf32, #tpu.memory_space<vmem>>, %arg10: memref<2x16xf32, #tpu.memory_space<vmem>>, %arg11: memref<2x32xf32, #tpu.memory_space<vmem>>, %arg12: memref<2x32xf32, #tpu.memory_space<vmem>>, %arg13: memref<8x2xf32, #tpu.memory_space<vmem>>) attributes {dimension_semantics = [], scalar_prefetch = 0 : i64, scratch_operands = 0 : i64, tpu.core_type = #tpu.core_type<tc>} {
    %c0 = arith.constant 0 : index
    %c0_0 = arith.constant 0 : index
    %0 = vector.load %arg4[%c0, %c0_0] : memref<16x32xf32, #tpu.memory_space<vmem>>, vector<16x32xf32>
    %c32 = arith.constant 32 : index
    %c0_1 = arith.constant 0 : index
    %1 = vector.load %arg6[%c32, %c0_1] : memref<64x32xf32, #tpu.memory_space<vmem>>, vector<32x32xf32>
    %c1 = arith.constant 1 : index
    %c0_2 = arith.constant 0 : index
    %2 = vector.load %arg9[%c1, %c0_2] : memref<3x128xf32, #tpu.memory_space<vmem>>, vector<1x32xf32>
    %cst = arith.constant dense<0.000000e+00> : vector<16x32xf32>
    %3 = tpu.matmul %0, %1, %cst {dimension_numbers = #tpu.dot_dimension_numbers<[1], [0], [0], [1], [0, 0, 1, 1], [], []>} : vector<16x32xf32>, vector<32x32xf32>, vector<16x32xf32> -> vector<16x32xf32>
    %4 = vector.broadcast %2 : vector<1x32xf32> to vector<16x32xf32>
    %5 = arith.addf %3, %4 : vector<16x32xf32>
    %c0_3 = arith.constant 0 : index
    %6 = memref.load %arg0[%c0_3] : memref<2xi32, #tpu.memory_space<smem>>
    %7 = arith.index_cast %6 : i32 to index
    %c0_4 = arith.constant 0 : index
    %8 = vector.load %arg1[%7, %c0_4] : memref<16x32xf32, #tpu.memory_space<vmem>>, vector<1x32xf32>
    %c1_5 = arith.constant 1 : index
    %9 = memref.load %arg0[%c1_5] : memref<2xi32, #tpu.memory_space<smem>>
    %10 = arith.index_cast %9 : i32 to index
    %c0_6 = arith.constant 0 : index
    %11 = vector.load %arg1[%10, %c0_6] : memref<16x32xf32, #tpu.memory_space<vmem>>, vector<1x32xf32>
    %12 = tpu.concatenate %8, %11 in 0 : vector<1x32xf32>, vector<1x32xf32> -> vector<2x32xf32>
    %c0_7 = arith.constant 0 : index
    %c0_8 = arith.constant 0 : index
    %13 = vector.load %arg2[%c0_7, %c0_8] : memref<2x32xf32, #tpu.memory_space<vmem>>, vector<2x32xf32>
    %c0_9 = arith.constant 0 : index
    %c0_10 = arith.constant 0 : index
    %14 = vector.load %arg3[%c0_9, %c0_10] : memref<2x32xf32, #tpu.memory_space<vmem>>, vector<2x32xf32>
    %c0_11 = arith.constant 0 : index
    %c0_12 = arith.constant 0 : index
    %15 = vector.load %arg5[%c0_11, %c0_12] : memref<64x128xf32, #tpu.memory_space<vmem>>, vector<32x128xf32>
    %c32_13 = arith.constant 32 : index
    %c0_14 = arith.constant 0 : index
    %16 = vector.load %arg5[%c32_13, %c0_14] : memref<64x128xf32, #tpu.memory_space<vmem>>, vector<32x128xf32>
    %c0_15 = arith.constant 0 : index
    %c0_16 = arith.constant 0 : index
    %17 = vector.load %arg9[%c0_15, %c0_16] : memref<3x128xf32, #tpu.memory_space<vmem>>, vector<1x128xf32>
    %cst_17 = arith.constant dense<0.000000e+00> : vector<2x128xf32>
    %18 = tpu.matmul %12, %15, %cst_17 {dimension_numbers = #tpu.dot_dimension_numbers<[1], [0], [0], [1], [0, 0, 1, 1], [], []>} : vector<2x32xf32>, vector<32x128xf32>, vector<2x128xf32> -> vector<2x128xf32>
    %cst_18 = arith.constant dense<0.000000e+00> : vector<2x128xf32>
    %19 = tpu.matmul %13, %16, %cst_18 {dimension_numbers = #tpu.dot_dimension_numbers<[1], [0], [0], [1], [0, 0, 1, 1], [], []>} : vector<2x32xf32>, vector<32x128xf32>, vector<2x128xf32> -> vector<2x128xf32>
    %20 = arith.addf %18, %19 : vector<2x128xf32>
    %21 = vector.broadcast %17 : vector<1x128xf32> to vector<2x128xf32>
    %22 = arith.addf %20, %21 : vector<2x128xf32>
    %23 = vector.extract_strided_slice %22 {offsets = [0, 0], sizes = [2, 32], strides = [1, 1]} : vector<2x128xf32> to vector<2x32xf32>
    %24 = arith.negf %23 : vector<2x32xf32>
    %25 = math.exp %24 : vector<2x32xf32>
    %cst_19 = arith.constant 1.000000e+00 : f32
    %26 = vector.broadcast %cst_19 : f32 to vector<2x32xf32>
    %27 = arith.addf %26, %25 : vector<2x32xf32>
    %28 = arith.divf %26, %27 : vector<2x32xf32>
    %29 = vector.extract_strided_slice %22 {offsets = [0, 32], sizes = [2, 32], strides = [1, 1]} : vector<2x128xf32> to vector<2x32xf32>
    %30 = arith.negf %29 : vector<2x32xf32>
    %31 = math.exp %30 : vector<2x32xf32>
    %cst_20 = arith.constant 1.000000e+00 : f32
    %32 = vector.broadcast %cst_20 : f32 to vector<2x32xf32>
    %33 = arith.addf %32, %31 : vector<2x32xf32>
    %34 = arith.divf %32, %33 : vector<2x32xf32>
    %35 = vector.extract_strided_slice %22 {offsets = [0, 64], sizes = [2, 32], strides = [1, 1]} : vector<2x128xf32> to vector<2x32xf32>
    %36 = math.tanh %35 : vector<2x32xf32>
    %37 = vector.extract_strided_slice %22 {offsets = [0, 96], sizes = [2, 32], strides = [1, 1]} : vector<2x128xf32> to vector<2x32xf32>
    %38 = arith.negf %37 : vector<2x32xf32>
    %39 = math.exp %38 : vector<2x32xf32>
    %cst_21 = arith.constant 1.000000e+00 : f32
    %40 = vector.broadcast %cst_21 : f32 to vector<2x32xf32>
    %41 = arith.addf %40, %39 : vector<2x32xf32>
    %42 = arith.divf %40, %41 : vector<2x32xf32>
    %43 = arith.mulf %34, %14 : vector<2x32xf32>
    %44 = arith.mulf %28, %36 : vector<2x32xf32>
    %45 = arith.addf %43, %44 : vector<2x32xf32>
    %46 = math.tanh %45 : vector<2x32xf32>
    %47 = arith.mulf %42, %46 : vector<2x32xf32>
    %c0_22 = arith.constant 0 : index
    %c0_23 = arith.constant 0 : index
    %48 = vector.load %arg6[%c0_22, %c0_23] : memref<64x32xf32, #tpu.memory_space<vmem>>, vector<32x32xf32>
    %cst_24 = arith.constant dense<0.000000e+00> : vector<2x32xf32>
    %49 = tpu.matmul %47, %48, %cst_24 {dimension_numbers = #tpu.dot_dimension_numbers<[1], [0], [0], [1], [0, 0, 1, 1], [], []>} : vector<2x32xf32>, vector<32x32xf32>, vector<2x32xf32> -> vector<2x32xf32>
    %c0_25 = arith.constant 0 : index
    %c0_26 = arith.constant 0 : index
    %50 = vector.load %arg7[%c0_25, %c0_26] : memref<32x1xf32, #tpu.memory_space<vmem>>, vector<32x1xf32>
    %51 = vector.extract_strided_slice %5 {offsets = [0, 0], sizes = [8, 32], strides = [1, 1]} : vector<16x32xf32> to vector<8x32xf32>
    %52 = vector.extract_strided_slice %49 {offsets = [0, 0], sizes = [1, 32], strides = [1, 1]} : vector<2x32xf32> to vector<1x32xf32>
    %53 = vector.broadcast %52 : vector<1x32xf32> to vector<8x32xf32>
    %54 = arith.addf %51, %53 : vector<8x32xf32>
    %55 = math.tanh %54 : vector<8x32xf32>
    %cst_27 = arith.constant dense<0.000000e+00> : vector<8x1xf32>
    %56 = tpu.matmul %55, %50, %cst_27 {dimension_numbers = #tpu.dot_dimension_numbers<[1], [0], [0], [1], [0, 0, 1, 1], [], []>} : vector<8x32xf32>, vector<32x1xf32>, vector<8x1xf32> -> vector<8x1xf32>
    %cst_28 = arith.constant dense<0xFF800000> : vector<1xf32>
    %57 = vector.multi_reduction <maximumf>, %56, %cst_28 [0] : vector<8x1xf32> to vector<1xf32>
    %58 = vector.shape_cast %57 : vector<1xf32> to vector<1x1xf32>
    %59 = vector.broadcast %58 : vector<1x1xf32> to vector<8x1xf32>
    %60 = arith.subf %56, %59 : vector<8x1xf32>
    %61 = math.exp %60 : vector<8x1xf32>
    %cst_29 = arith.constant dense<0.000000e+00> : vector<1xf32>
    %62 = vector.multi_reduction <add>, %61, %cst_29 [0] : vector<8x1xf32> to vector<1xf32>
    %63 = vector.shape_cast %62 : vector<1xf32> to vector<1x1xf32>
    %64 = vector.broadcast %63 : vector<1x1xf32> to vector<8x1xf32>
    %65 = arith.divf %61, %64 : vector<8x1xf32>
    %66 = vector.extract_strided_slice %0 {offsets = [0, 0], sizes = [8, 32], strides = [1, 1]} : vector<16x32xf32> to vector<8x32xf32>
    %67 = vector.broadcast %65 : vector<8x1xf32> to vector<8x32xf32>
    %68 = arith.mulf %67, %66 : vector<8x32xf32>
    %cst_30 = arith.constant dense<0.000000e+00> : vector<32xf32>
    %69 = vector.multi_reduction <add>, %68, %cst_30 [0] : vector<8x32xf32> to vector<32xf32>
    %70 = vector.shape_cast %69 : vector<32xf32> to vector<1x32xf32>
    %71 = vector.extract_strided_slice %5 {offsets = [8, 0], sizes = [8, 32], strides = [1, 1]} : vector<16x32xf32> to vector<8x32xf32>
    %72 = vector.extract_strided_slice %49 {offsets = [1, 0], sizes = [1, 32], strides = [1, 1]} : vector<2x32xf32> to vector<1x32xf32>
    %73 = vector.broadcast %72 : vector<1x32xf32> to vector<8x32xf32>
    %74 = arith.addf %71, %73 : vector<8x32xf32>
    %75 = math.tanh %74 : vector<8x32xf32>
    %cst_31 = arith.constant dense<0.000000e+00> : vector<8x1xf32>
    %76 = tpu.matmul %75, %50, %cst_31 {dimension_numbers = #tpu.dot_dimension_numbers<[1], [0], [0], [1], [0, 0, 1, 1], [], []>} : vector<8x32xf32>, vector<32x1xf32>, vector<8x1xf32> -> vector<8x1xf32>
    %cst_32 = arith.constant dense<0xFF800000> : vector<1xf32>
    %77 = vector.multi_reduction <maximumf>, %76, %cst_32 [0] : vector<8x1xf32> to vector<1xf32>
    %78 = vector.shape_cast %77 : vector<1xf32> to vector<1x1xf32>
    %79 = vector.broadcast %78 : vector<1x1xf32> to vector<8x1xf32>
    %80 = arith.subf %76, %79 : vector<8x1xf32>
    %81 = math.exp %80 : vector<8x1xf32>
    %cst_33 = arith.constant dense<0.000000e+00> : vector<1xf32>
    %82 = vector.multi_reduction <add>, %81, %cst_33 [0] : vector<8x1xf32> to vector<1xf32>
    %83 = vector.shape_cast %82 : vector<1xf32> to vector<1x1xf32>
    %84 = vector.broadcast %83 : vector<1x1xf32> to vector<8x1xf32>
    %85 = arith.divf %81, %84 : vector<8x1xf32>
    %86 = vector.extract_strided_slice %0 {offsets = [8, 0], sizes = [8, 32], strides = [1, 1]} : vector<16x32xf32> to vector<8x32xf32>
    %87 = vector.broadcast %85 : vector<8x1xf32> to vector<8x32xf32>
    %88 = arith.mulf %87, %86 : vector<8x32xf32>
    %cst_34 = arith.constant dense<0.000000e+00> : vector<32xf32>
    %89 = vector.multi_reduction <add>, %88, %cst_34 [0] : vector<8x32xf32> to vector<32xf32>
    %90 = vector.shape_cast %89 : vector<32xf32> to vector<1x32xf32>
    %91 = tpu.concatenate %70, %90 in 0 : vector<1x32xf32>, vector<1x32xf32> -> vector<2x32xf32>
    %92 = tpu.concatenate %65, %85 in 1 : vector<8x1xf32>, vector<8x1xf32> -> vector<8x2xf32>
    %c0_35 = arith.constant 0 : index
    %c0_36 = arith.constant 0 : index
    %93 = vector.load %arg8[%c0_35, %c0_36] : memref<64x16xf32, #tpu.memory_space<vmem>>, vector<32x16xf32>
    %c32_37 = arith.constant 32 : index
    %c0_38 = arith.constant 0 : index
    %94 = vector.load %arg8[%c32_37, %c0_38] : memref<64x16xf32, #tpu.memory_space<vmem>>, vector<32x16xf32>
    %c2 = arith.constant 2 : index
    %c0_39 = arith.constant 0 : index
    %95 = vector.load %arg9[%c2, %c0_39] : memref<3x128xf32, #tpu.memory_space<vmem>>, vector<1x16xf32>
    %cst_40 = arith.constant dense<0.000000e+00> : vector<2x16xf32>
    %96 = tpu.matmul %47, %93, %cst_40 {dimension_numbers = #tpu.dot_dimension_numbers<[1], [0], [0], [1], [0, 0, 1, 1], [], []>} : vector<2x32xf32>, vector<32x16xf32>, vector<2x16xf32> -> vector<2x16xf32>
    %cst_41 = arith.constant dense<0.000000e+00> : vector<2x16xf32>
    %97 = tpu.matmul %91, %94, %cst_41 {dimension_numbers = #tpu.dot_dimension_numbers<[1], [0], [0], [1], [0, 0, 1, 1], [], []>} : vector<2x32xf32>, vector<32x16xf32>, vector<2x16xf32> -> vector<2x16xf32>
    %98 = arith.addf %96, %97 : vector<2x16xf32>
    %99 = vector.broadcast %95 : vector<1x16xf32> to vector<2x16xf32>
    %100 = arith.addf %98, %99 : vector<2x16xf32>
    %c0_42 = arith.constant 0 : index
    %c0_43 = arith.constant 0 : index
    %101 = vector.load %arg10[%c0_42, %c0_43] : memref<2x16xf32, #tpu.memory_space<vmem>>, vector<2x16xf32>
    tpu.vector_store %arg10[%c0_42, %c0_43], %100 {strides = array<i32>} : memref<2x16xf32, #tpu.memory_space<vmem>>, vector<2x16xf32>,
    %c0_44 = arith.constant 0 : index
    %c0_45 = arith.constant 0 : index
    %102 = vector.load %arg11[%c0_44, %c0_45] : memref<2x32xf32, #tpu.memory_space<vmem>>, vector<2x32xf32>
    tpu.vector_store %arg11[%c0_44, %c0_45], %47 {strides = array<i32>} : memref<2x32xf32, #tpu.memory_space<vmem>>, vector<2x32xf32>,
    %c0_46 = arith.constant 0 : index
    %c0_47 = arith.constant 0 : index
    %103 = vector.load %arg12[%c0_46, %c0_47] : memref<2x32xf32, #tpu.memory_space<vmem>>, vector<2x32xf32>
    tpu.vector_store %arg12[%c0_46, %c0_47], %45 {strides = array<i32>} : memref<2x32xf32, #tpu.memory_space<vmem>>, vector<2x32xf32>,
    %c0_48 = arith.constant 0 : index
    %c0_49 = arith.constant 0 : index
    %104 = vector.load %arg13[%c0_48, %c0_49] : memref<8x2xf32, #tpu.memory_space<vmem>>, vector<8x2xf32>
    tpu.vector_store %arg13[%c0_48, %c0_49], %92 {strides = array<i32>} : memref<8x2xf32, #tpu.memory_space<vmem>>, vector<8x2xf32>,
    return
  }
}

</mosaic_0001>

<bundles_post_ra>
// kernel: decoder_step.1
= control target key start
LH: loop header
LB: loop body
LE: loop exit
PB: predicated region body
PF: predicated region fallthrough
CT: control target
= control target key end

     0   :  { %19 = vsyncpa [#allocation4], 0  ;;  %s1494_s0 = inlined_call_operand.vmem [shape: s32[2], index: 0, kind: input, shape index: {}]   ;;  %s1495_s1 = inlined_call_operand.vmem [shape: f32[16,32], index: 1, kind: input, shape index: {}]   ;;  %s1496_s2 = inlined_call_operand.vmem [shape: f32[2,32], index: 2, kind: input, shape index: {}]   ;;  %s1497_s3 = inlined_call_operand.vmem [shape: f32[2,32], index: 3, kind: input, shape index: {}]   ;;  %s1498_s4 = inlined_call_operand.vmem [shape: f32[16,32], index: 4, kind: input, shape index: {}]   ;;  %s1499_s5 = inlined_call_operand.vmem [shape: f32[64,128], index: 5, kind: input, shape index: {}]   ;;  %s1500_s6 = inlined_call_operand.vmem [shape: f32[64,32], index: 6, kind: input, shape index: {}]   ;;  %s1501_s7 = inlined_call_operand.vmem [shape: f32[32,1], index: 7, kind: input, shape index: {}]   ;;  %s1502_s8 = inlined_call_operand.vmem [shape: f32[64,16], index: 8, kind: input, shape index: {}]   ;;  %s1503_s9 = inlined_call_operand.vmem [shape: f32[3,128], index: 9, kind: input, shape index: {}]   ;;  %s1504_s10 = inlined_call_operand.hbm [shape: f32[2,16], index: 10, kind: output, shape index: {0}]   ;;  %s1505_s11 = inlined_call_operand.hbm [shape: f32[2,32], index: 11, kind: output, shape index: {1}]   ;;  %s1506_s12 = inlined_call_operand.hbm [shape: f32[2,32], index: 12, kind: output, shape index: {2}]   ;;  %s1507_s13 = inlined_call_operand.vmem [shape: f32[8,2], index: 13, kind: output, shape index: {3}]  }
   0x1   :  { %20 = vsyncpa [#allocation3], 0 }
   0x2   :  { %21 = vsyncpa [#allocation7], 0  ;;  %s28_s27 = sshll.u32 %s1494_s0, 4  ;;  %s29_s27 = int_to_ptr.vmem [resolvable:$true] %s28_s27 }
   0x3   :  { %s1103_s28 = scalar_lea.vmem %s29_s27, 16  ;;  %p1108_p1 = scmp.lt.s32.totalorder %s29_s27, %s29_s27 }
   0x4   :  { %p1104_p0 = scmp.ne.s32.totalorder %s29_s27, %s1103_s28  ;;  %p1109_p2 = scmp.lt.s32.totalorder %s1103_s28, %s1103_s28 }
   0x6   :  { %p1110_p3 = por %p1109_p2, %p1108_p1 }
   0x8   :  { %p1111_p4 = pnand %p1110_p3, %p1104_p0 }
   0xa   :  { %1114 = shalt.err (!%p1111_p4)
}
   0xb   :  { %s1187_s29 = smov [#allocation2]  }
   0xc   :  { %31 = dma.vmem_to_smem %s29_s27, 16, %s1187_s29, [#allocation4]  }
   0xd   :  { %1181 = dma.done.wait [#allocation4], 16  }
   0xe   :  { %1182 = vsyncadd [#allocation4], 4294967280 }
   0xf   :  { %53 = sfence }
  0x10   :  { %v56_v0 = vld [vmem:[%s1500_s6 + $0x20] sm:$0xff]  ;;  %v57_v1 = vld [vmem:[%s1500_s6 + $0x28] sm:$0xff]  ;;  %v58_v2 = vld [vmem:[%s1500_s6 + $0x30] sm:$0xff]  ;;  %vm65_vm0 = vcmask 261120   ;;  %v1188_v6 = vmov 0.0|0.0   ;;  %vm1189_vm1 = vmmov 0  }
  0x11   :  { %v1019_v3 = vpack.c.bf16 %v57_v1, %v56_v0  ;;  %v59_v4 = vld [vmem:[%s1500_s6 + $0x38] sm:$0xff]  ;;  %v1287_v5 = vld [vmem:[%s1498_s4] sm:$0xff]  ;;  %1027 = vmatprep.subr.bf16.mxu1 %v1188_v6  ;;  %v165_v9 = vld [vmem:[%s1499_s5 + $0x28] sm:$0xff]  ;;  %v1190_v10 = vmov 0.0   ;;  %s1300_s26 = sld [smem:[#allocation2]]  ;;  %s879_s27 = sld [smem:[#allocation2 + $0x1]]  ;;  %v431_v0 = vlaneseq }
  0x12   :  { %v1023_v7 = vpack.c.bf16 %v59_v4, %v58_v2  ;;  %939 = vmatprep.mubr.msk.f32.mxu0 %vm65_vm0, %v1287_v5  ;;  %v164_v8 = vld [vmem:[%s1499_s5 + $0x20] sm:$0xff]  ;;  %950 = vmatprep.mubr.msk.f32.mxu1 %vm1189_vm1, %v1190_v10  ;;  %v166_v12 = vld [vmem:[%s1499_s5 + $0x30] sm:$0xff]  ;;  %v167_v13 = vld [vmem:[%s1499_s5 + $0x38] sm:$0xff]  ;;  %vm156_vm2 = vcmask 1040384   ;;  %s1192_s16 = smov 32   ;;  %vm819_vm3 = vcmask 254976  }
  0x13   :  { %1020 = vmatprep.subr.bf16.mxu0 %v1019_v3  ;;  %v1028_v11 = vpack.c.bf16 %v165_v9, %v164_v8  ;;  %v160_v14 = vld [vmem:[%s1499_s5] sm:$0xff]  ;;  %v161_v15 = vld [vmem:[%s1499_s5 + $0x8] sm:$0xff]  ;;  %v1031_v16 = vpack.c.bf16 %v167_v13, %v166_v12  ;;  %v162_v19 = vld [vmem:[%s1499_s5 + $0x10] sm:$0xff]  ;;  %v432_v1 = vshrl.u32 %v431_v0, 7  ;;  %vm510_vm4 = vcmask 7168   ;;  %s1195_s17 = smov 96  }
  0x14   :  { %1022 = vmatpush3.bf16.msra.mxu0 %v1019_v3  ;;  %v1318_v17 = vld [vmem:[%s1498_s4 + $0x8] sm:$0xff]  ;;  %v1034_v18 = vpack.c.bf16 %v161_v15, %v160_v14  ;;  %v163_v20 = vld [vmem:[%s1499_s5 + $0x18] sm:$0xff]  ;;  %v158_v21 = vld [vmem:[%s1496_s2] sm:$0x3]  ;;  %s1191_s5 = smov 64   ;;  %vm826_vm5 = vcmask 15360  }
  0x15   :  { %1024 = vmatprep.subr.bf16.mxu0 %v1023_v7  ;;  %1029 = vmatpush3.bf16.msra.mxu1 %v1028_v11  ;;  %v1037_v23 = vpack.c.bf16 %v163_v20, %v162_v19  ;;  %v882_v31 = vld [vmem:[%s1503_s9] ss:$0 sm:$0xff]  ;;  %v349_v49 = vld [vmem:[%s1500_s6 + $0x8] sm:$0xff]  ;;  %v350_v50 = vld [vmem:[%s1500_s6 + $0x10] sm:$0xff]  ;;  %v433_v2 = vsub.s32 0, %v432_v1  ;;  %v545_v3 = vsub.s32 1, %v432_v1 }
  0x16   :  { %1030 = vmatprep.subr.bf16.mxu1 %v1188_v6  ;;  %v159_v37 = vld [vmem:[%s1497_s3] sm:$0x3]  ;;  %v351_v52 = vld [vmem:[%s1500_s6 + $0x18] sm:$0xff]  ;;  %v428_v59 = vld [vmem:[%s1501_s7 + $0x8] sm:$0xff]  ;;  %s1194_s3 = smov 1   ;;  %s1196_s28 = smov [#allocation6]  }
  0x17   :  { %s151_s24 = scalar_lea.vmem %s1495_s1, %s879_s27  ;;  %s148_s15 = scalar_lea.vmem %s1495_s1, %s1300_s26  ;;  %v348_v48 = vld [vmem:[%s1500_s6] sm:$0xff]  ;;  %v1043_v53 = vpack.c.bf16 %v351_v52, %v350_v50  ;;  %v429_v60 = vld [vmem:[%s1501_s7 + $0x10] sm:$0xff]  ;;  %v430_v62 = vld [vmem:[%s1501_s7 + $0x18] sm:$0xff] }
  0x18   :  { %1026 = vmatpush3.bf16.msra.mxu0 %v1023_v7  ;;  %v152_v22 = vld [vmem:[%s151_s24] sm:$0x1]  ;;  %v1040_v51 = vpack.c.bf16 %v349_v49, %v348_v48  ;;  %v1049_v63 = vpack.c.bf16 %v430_v62, %v429_v60  ;;  %v876_v4 = vld [vmem:[%s1503_s9 + $0x1] ss:$0 sm:$0xff]  ;;  %s844_s29 = sshll.u32 %s1196_s28, 4  ;;  %s845_s29 = int_to_ptr.vmem [resolvable:$true] %s844_s29 }
  0x19   :  { %1033 = vmatprep.subr.bf16.mxu0 %v1188_v6  ;;  %1032 = vmatpush3.bf16.msra.mxu1 %v1031_v16  ;;  %v154_v24 = vrot.slane %v152_v22, 7  ;;  %v149_v25 = vld [vmem:[%s148_s15] sm:$0x1]  ;;  %v662_v22 = vld [vmem:[%s1502_s8 + $0x18] sm:$0xff]  ;;  %p1120_p6 = scmp.lt.s32.totalorder %s845_s29, %s845_s29 }
  0x1a   :  { %1039 = vmatprep.subr.bf16.mxu1 %v1188_v6  ;;  %v427_v58 = vld [vmem:[%s1501_s7] sm:$0xff] }
  0x1b   :  { %940 = vmatmul.mubr.msk.f32.vlgmr.msra.gmra.mrb[0].mxu0 %vm65_vm0, %v1318_v17  ;;  %v157_v26 = vsel %vm156_vm2, %v149_v25, %v154_v24  ;;  %v1046_v61 = vpack.c.bf16 %v428_v59, %v427_v58  ;;  %v659_v16 = vld [vmem:[%s1502_s8] sm:$0xff]  ;;  %v1193_v25 = vmov 0  }
  0x1c   :  { %1035 = vmatpush3.bf16.msra.mxu0 %v1034_v18  ;;  %951 = vmatmul.mubr.msk.f32.vlgmr.msra.gmra.mrb[0].mxu1 %vm65_vm0, %v158_v21  ;;  %v660_v18 = vld [vmem:[%s1502_s8 + $0x8] sm:$0xff]  ;;  %v661_v21 = vld [vmem:[%s1502_s8 + $0x10] sm:$0xff] }
  0x1d   :  { %1036 = vmatprep.subr.bf16.mxu0 %v1188_v6  ;;  %961 = vmatprep.mubr.msk.f32.mxu0 %vm1189_vm1, %v1190_v10  ;;  %v1064_v19 = vpack.c.bf16 %v660_v18, %v659_v16  ;;  %v1067_v24 = vpack.c.bf16 %v662_v22, %v661_v21 }
  0x1e   :  { %972 = vmatprep.mubr.msk.f32.mxu1 %vm1189_vm1, %v1190_v10  ;;  %1041 = vmatpush3.bf16.msra.mxu1 %v1040_v51 }
  0x1f   :  { %1042 = vmatprep.subr.bf16.mxu1 %v1188_v6  ;;  %1082 = vset.pattern.permute.xlu0 %v1193_v25 }
  0x20   :  { %1038 = vmatpush3.bf16.msra.mxu0 %v1037_v23  ;;  %1081 = vset.pattern.permute.xlu1 %v1193_v25 }
  0x21   :  { %1045 = vmatprep.subr.bf16.mxu0 %v1188_v6 }
  0x22   :  { %1044 = vmatpush3.bf16.msra.mxu1 %v1043_v53 }
  0x23   :  { %962 = vmatmul.mubr.msk.f32.vlgmr.msra.gmra.mrb[2].mxu0 %vm65_vm0, %v157_v26  ;;  %1051 = vmatprep.subr.bf16.mxu1 %v1188_v6 }
  0x24   :  { %983 = vmatprep.mubr.msk.f32.mxu0 %vm1189_vm1, %v1190_v10  ;;  %1047 = vmatpush3.bf16.msra.mxu0 %v1046_v61 }
  0x25   :  { %1048 = vmatprep.subr.bf16.mxu0 %v1188_v6 }
  0x28   :  { %1050 = vmatpush3.bf16.msra.mxu0 %v1049_v63 }
  0x29   :  { %1057 = vmatprep.subr.bf16.mxu0 %v1188_v6 }
  0xee   :  { %v1351_v27 = vpop.f32.mrb[0].mxu0 }
  0xef   :  { %v1353_v28 = vpop.f32.mrb[1].mxu0  ;;  %v238_v29 = vpop.f32.mrb[0].mxu1  ;;  %v144_v8 = vadd.f32 %v1351_v27, %v876_v4 }
  0xf0   :  { %v952_v30 = vpop.f32.mrb[1].mxu1  ;;  %v139_v9 = vadd.f32 %v876_v4, %v1353_v28 }
  0xf6   :  { %v311_v32 = vpop.f32.mrb[2].mxu0 }
  0xf7   :  { %v312_v33 = vadd.f32 %v311_v32, %v238_v29  ;;  %v963_v34 = vpop.f32.mrb[3].mxu0 }
  0xf9   :  { %v319_v35 = vadd.f32 %v882_v31, %v312_v33 }
  0xfb   :  { %1083 = vtanh.f32 %v319_v35  ;;  %v883_v38 = vmul.f32 -1.442695, %v319_v35 }
  0xfd   :  { %1085 = vpow2.f32 %v883_v38 }
 0x105   :  { %v1084_v36 = vpop.eup %1083 }
 0x106   :  { %333 = vrot.lane.b32.xlu0 %v1084_v36, %s1191_s5 }
 0x107   :  { %v1086_v39 = vpop.eup %1085 }
 0x108   :  { %v323_v40 = vadd.f32 1.0, %v1086_v39 }
 0x10a   :  { %328 = vrot.lane.b32.xlu0 %v159_v37, %s1192_s16  ;;  %1087 = vrcp.f32 %v323_v40 }
 0x114   :  { %v1088_v41 = vpop.eup %1087 }
 0x178   :  { %v334_v42 = vpop.permute.xlu0 %333 }
 0x179   :  { %v336_v43 = vmul.f32 %v1088_v41, %v334_v42 }
 0x17b   :  { %338 = vrot.lane.b32.xlu1 %v336_v43, %s1192_s16 }
 0x17c   :  { %v329_v44 = vpop.permute.xlu0 %328 }
 0x17d   :  { %v331_v45 = vmul.f32 %v1088_v41, %v329_v44 }
 0x1ed   :  { %v339_v46 = vpop.permute.xlu1 %338 }
 0x1ee   :  { %v1361_v47 = vadd.f32 %v339_v46, %v331_v45 }
 0x1f0   :  { %1089 = vtanh.f32 %v1361_v47 }
 0x1fa   :  { %v1090_v54 = vpop.eup %1089 }
 0x1fb   :  { %344 = vrot.lane.b32.xlu1 %v1090_v54, %s1191_s5 }
 0x26d   :  { %v345_v55 = vpop.permute.xlu1 %344 }
 0x26e   :  { %v347_v56 = vmul.f32 %v1088_v41, %v345_v55 }
 0x270   :  { %353 = vrot.lane.b32.xlu0 %v347_v56, %s1192_s16 }
 0x2e2   :  { %v354_v57 = vpop.permute.xlu0 %353 }
 0x2e3   :  { %973 = vmatmul.mubr.msk.f32.vlgmr.msra.gmra.mrb[2].mxu1 %vm65_vm0, %v354_v57  ;;  %820 = vst.msk [vmem:[#allocation6] sm:$0x3] %vm819_vm3, %v354_v57 }
 0x2e4   :  { %994 = vmatprep.mubr.msk.f32.mxu1 %vm1189_vm1, %v1190_v10  ;;  %1053 = vmatpush3.bf16.msra.mxu1 %v1046_v61 }
 0x2e5   :  { %1054 = vmatprep.subr.bf16.mxu1 %v1188_v6 }
 0x2e8   :  { %1056 = vmatpush3.bf16.msra.mxu1 %v1049_v63 }
 0x2e9   :  { %1063 = vmatprep.subr.bf16.mxu1 %v1188_v6 }
 0x3b6   :  { %v423_v7 = vpop.f32.mrb[2].mxu1 }
 0x3b7   :  { %v434_v11 = vrot.slane %v423_v7, %v433_v2  ;;  %v546_v12 = vrot.slane %v423_v7, %v545_v3  ;;  %v974_v13 = vpop.f32.mrb[3].mxu1 }
 0x3b9   :  { %v435_v14 = vadd.f32 %v434_v11, %v139_v9  ;;  %v547_v15 = vadd.f32 %v546_v12, %v144_v8  ;;  %v663_v8 = vld [vmem:[%s1502_s8 + $0x20] sm:$0xff]  ;;  %v664_v9 = vld [vmem:[%s1502_s8 + $0x28] sm:$0xff]  ;;  %v665_v12 = vld [vmem:[%s1502_s8 + $0x30] sm:$0xff] }
 0x3ba   :  { %v1058_v11 = vpack.c.bf16 %v664_v9, %v663_v8 }
 0x3bb   :  { %1091 = vtanh.f32 %v435_v14 }
 0x3bc   :  { %1093 = vtanh.f32 %v547_v15 }
 0x3c5   :  { %v1092_v20 = vpop.eup %1091 }
 0x3c6   :  { %v1094_v23 = vpop.eup %1093  ;;  %984 = vmatmul.mubr.msk.f32.vlgmr.msra.gmra.mrb[4].mxu0 %vm65_vm0, %v1092_v20 }
 0x3c7   :  { %995 = vmatmul.mubr.msk.f32.vlgmr.msra.gmra.mrb[4].mxu1 %vm65_vm0, %v1094_v23  ;;  %1005 = vmatprep.mubr.msk.f32.mxu0 %vm1189_vm1, %v1190_v10 }
 0x3c8   :  { %1065 = vmatpush3.bf16.msra.mxu1 %v1064_v19  ;;  %1016 = vmatprep.mubr.msk.f32.mxu1 %vm1189_vm1, %v1190_v10 }
 0x3c9   :  { %1066 = vmatprep.subr.bf16.mxu1 %v1188_v6  ;;  %1059 = vmatpush3.bf16.msra.mxu0 %v1058_v11 }
 0x3ca   :  { %1060 = vmatprep.subr.bf16.mxu0 %v1188_v6 }
 0x3cc   :  { %1068 = vmatpush3.bf16.msra.mxu1 %v1067_v24 }
 0x3cf   :  { %1017 = vmatmul.mubr.msk.f32.vlgmr.msra.gmra.mrb[6].mxu1 %vm65_vm0, %v354_v57 }
 0x499   :  { %v506_v26 = vpop.f32.mrb[4].mxu0 }
 0x49a   :  { %v511_v27 = vsel %vm510_vm4, %v506_v26, -inf  ;;  %v618_v28 = vpop.f32.mrb[4].mxu1  ;;  %v985_v29 = vpop.f32.mrb[5].mxu0 }
 0x49b   :  { %v512_v30 = vrot.slane %v511_v27, 4  ;;  %v622_v31 = vsel %vm510_vm4, %v618_v28, -inf  ;;  %v996_v32 = vpop.f32.mrb[5].mxu1 }
 0x49c   :  { %v623_v33 = vrot.slane %v622_v31, 4 }
 0x49d   :  { %v513_v10 = vmax.f32 %v511_v27, %v512_v30 }
 0x49e   :  { %v624_v34 = vmax.f32 %v622_v31, %v623_v33 }
 0x49f   :  { %v514_v35 = vrot.slane %v513_v10, 2 }
 0x4a0   :  { %v625_v36 = vrot.slane %v624_v34, 2 }
 0x4a1   :  { %v515_v37 = vmax.f32 %v513_v10, %v514_v35 }
 0x4a2   :  { %v626_v38 = vmax.f32 %v624_v34, %v625_v36  ;;  %v1425_v39 = vpop.f32.mrb[6].mxu1 }
 0x4a3   :  { %v516_v40 = vrot.slane %v515_v37, 1  ;;  %v1018_v41 = vpop.f32.mrb[7].mxu1 }
 0x4a4   :  { %v627_v42 = vrot.slane %v626_v38, 1 }
 0x4a5   :  { %v517_v43 = vmax.f32 %v515_v37, %v516_v40 }
 0x4a6   :  { %v628_v44 = vmax.f32 %v626_v38, %v627_v42 }
 0x4a7   :  { %v518_v45 = vsub.f32 %v506_v26, %v517_v43 }
 0x4a8   :  { %v629_v46 = vsub.f32 %v618_v28, %v628_v44 }
 0x4a9   :  { %v519_v48 = vmul.f32 1.442695, %v518_v45 }
 0x4aa   :  { %v630_v49 = vmul.f32 1.442695, %v629_v46 }
 0x4ab   :  { %1095 = vpow2.f32 %v519_v48 }
 0x4ac   :  { %1097 = vpow2.f32 %v630_v49 }
 0x4b5   :  { %v1096_v50 = vpop.eup %1095 }
 0x4b6   :  { %v1098_v51 = vpop.eup %1097  ;;  %v521_v52 = vsel %vm510_vm4, %v1096_v50, 0.0 }
 0x4b7   :  { %v522_v53 = vrot.slane %v521_v52, 4  ;;  %v632_v54 = vsel %vm510_vm4, %v1098_v51, 0.0 }
 0x4b8   :  { %v633_v55 = vrot.slane %v632_v54, 4 }
 0x4b9   :  { %v523_v56 = vadd.f32 %v522_v53, %v521_v52 }
 0x4ba   :  { %v634_v57 = vadd.f32 %v633_v55, %v632_v54 }
 0x4bb   :  { %v524_v58 = vrot.slane %v523_v56, 2 }
 0x4bc   :  { %v635_v59 = vrot.slane %v634_v57, 2 }
 0x4bd   :  { %v525_v60 = vadd.f32 %v524_v58, %v523_v56 }
 0x4be   :  { %v636_v61 = vadd.f32 %v635_v59, %v634_v57 }
 0x4bf   :  { %v526_v62 = vrot.slane %v525_v60, 1 }
 0x4c0   :  { %v637_v63 = vrot.slane %v636_v61, 1 }
 0x4c1   :  { %v527_v0 = vadd.f32 %v526_v62, %v525_v60 }
 0x4c2   :  { %v638_v1 = vadd.f32 %v637_v63, %v636_v61 }
 0x4c3   :  { %1099 = vrcp.f32 %v527_v0 }
 0x4c4   :  { %1101 = vrcp.f32 %v638_v1 }
 0x4cd   :  { %v1100_v2 = vpop.eup %1099 }
 0x4ce   :  { %v1102_v3 = vpop.eup %1101  ;;  %v529_v4 = vmul.f32 %v1100_v2, %v1096_v50 }
 0x4cf   :  { %v640_v7 = vmul.f32 %v1102_v3, %v1098_v51 }
 0x4d0   :  { %532 = vperm.xlu1 %1081, %v529_v4  }
 0x4d1   :  { %643 = vperm.xlu0 %1082, %v640_v7  }
 0x4d4   :  { %655 = vrot.lane.b32.xlu1 %v640_v7, %s1194_s3 }
 0x4d8   :  { %822 = vrot.lane.b32.xlu1 %v1361_v47, %s1195_s17  ;;  %v666_v47 = vld [vmem:[%s1502_s8 + $0x38] sm:$0xff] }
 0x4d9   :  { %v1061_v13 = vpack.c.bf16 %v666_v47, %v665_v12 }
 0x4db   :  { %1062 = vmatpush3.bf16.msra.mxu0 %v1061_v13 }
 0x54f   :  { %v533_v14 = vpop.permute.xlu1 %532 }
 0x550   :  { %v644_v15 = vpop.permute.xlu0 %643  ;;  %v535_v16 = vmul.f32 %v533_v14, %v1287_v5 }
 0x551   :  { %v646_v18 = vmul.f32 %v644_v15, %v1318_v17 }
 0x552   :  { %v536_v19 = vsel %vm65_vm0, %v535_v16, 0.0 }
 0x553   :  { %v647_v6 = vsel %vm65_vm0, %v646_v18, 0.0  ;;  %v537_v20 = vrot.slane %v536_v19, 4  ;;  %v656_v21 = vpop.permute.xlu1 %655 }
 0x554   :  { %v648_v22 = vrot.slane %v647_v6, 4  ;;  %v658_v23 = vsel %vm510_vm4, %v529_v4, %v656_v21 }
 0x555   :  { %v538_v24 = vadd.f32 %v537_v20, %v536_v19  ;;  %827 = vst.msk [vmem:[%s1507_s13] sm:$0xff] %vm826_vm5, %v658_v23  ;;  %s1115_s13 = scalar_lea.vmem %s845_s29, 32 }
 0x556   :  { %v649_v25 = vadd.f32 %v648_v22, %v647_v6  ;;  %p1116_p5 = scmp.ne.s32.totalorder %s845_s29, %s1115_s13  ;;  %p1121_p7 = scmp.lt.s32.totalorder %s1115_s13, %s1115_s13 }
 0x557   :  { %v539_v26 = vrot.slane %v538_v24, 2  ;;  %v823_v5 = vpop.permute.xlu1 %822 }
 0x558   :  { %v650_v27 = vrot.slane %v649_v25, 2  ;;  %825 = vst.msk [vmem:[#allocation8] sm:$0x3] %vm819_vm3, %v823_v5  ;;  %p1122_p8 = por %p1121_p7, %p1120_p6 }
 0x559   :  { %v540_v17 = vadd.f32 %v539_v26, %v538_v24 }
 0x55a   :  { %v651_v28 = vadd.f32 %v650_v27, %v649_v25  ;;  %p1123_p9 = pnand %p1122_p8, %p1116_p5 }
 0x55b   :  { %v541_v29 = vrot.slane %v540_v17, 1 }
 0x55c   :  { %v652_v30 = vrot.slane %v651_v28, 1 }
 0x55d   :  { %v542_v31 = vadd.f32 %v541_v29, %v540_v17 }
 0x55e   :  { %v653_v32 = vadd.f32 %v652_v30, %v651_v28 }
 0x560   :  { %v654_v33 = vsel %vm156_vm2, %v542_v31, %v653_v32 }
 0x561   :  { %1006 = vmatmul.mubr.msk.f32.vlgmr.msra.gmra.mrb[6].mxu0 %vm65_vm0, %v654_v33 }
 0x562   :  { %1126 = shalt.err (!%p1123_p9)
}
 0x563   :  { %s1127_s14 = scalar_lea.hbm %s1505_s11, 32 }
 0x564   :  { %p1128_p10 = scmp.ne.s32.totalorder %s1505_s11, %s1127_s14  ;;  %p1131_p11 = scmp.lt.u32.totalorder %s1127_s14, %s1505_s11 }
 0x566   :  { %p1133_p12 = pnand %p1131_p11, %p1128_p10 }
 0x568   :  { %1136 = shalt.err (!%p1133_p12)
}
 0x569   :  { %847 = dma.vmem_to_hbm [thread:$0]  %s845_s29, 32, %s1505_s11, [#allocation7]  }
 0x56a   :  { %s1197_s27 = smov [#allocation8]  }
 0x56b   :  { %s854_s16 = sshll.u32 %s1197_s27, 4  ;;  %s855_s16 = int_to_ptr.vmem [resolvable:$true] %s854_s16 }
 0x56c   :  { %s1137_s0 = scalar_lea.vmem %s855_s16, 32  ;;  %p1142_p0 = scmp.lt.s32.totalorder %s855_s16, %s855_s16 }
 0x56d   :  { %p1138_p13 = scmp.ne.s32.totalorder %s855_s16, %s1137_s0  ;;  %p1143_p1 = scmp.lt.s32.totalorder %s1137_s0, %s1137_s0 }
 0x56f   :  { %p1144_p2 = por %p1143_p1, %p1142_p0 }
 0x571   :  { %p1145_p3 = pnand %p1144_p2, %p1138_p13 }
 0x573   :  { %1148 = shalt.err (!%p1145_p3)
}
 0x574   :  { %s1149_s18 = scalar_lea.hbm %s1506_s12, 32 }
 0x575   :  { %p1150_p4 = scmp.ne.s32.totalorder %s1506_s12, %s1149_s18  ;;  %p1153_p5 = scmp.lt.u32.totalorder %s1149_s18, %s1506_s12 }
 0x577   :  { %p1155_p6 = pnand %p1153_p5, %p1150_p4 }
 0x579   :  { %1158 = shalt.err (!%p1155_p6)
}
 0x57a   :  { %857 = dma.vmem_to_hbm [thread:$0]  %s855_s16, 32, %s1506_s12, [#allocation7]   ;;  %v889_v34 = vld [vmem:[%s1503_s9 + $0x2] ss:$0 sm:$0xff]  ;;  %vm816_vm6 = vcmask 123904  }
 0x57b   :  { %s1198_s8 = smov [#allocation5]  }
 0x57c   :  { %s834_s25 = sshll.u32 %s1198_s8, 4  ;;  %s835_s25 = int_to_ptr.vmem [resolvable:$true] %s834_s25 }
 0x57d   :  { %s1159_s28 = scalar_lea.vmem %s835_s25, 32  ;;  %p1164_p8 = scmp.lt.s32.totalorder %s835_s25, %s835_s25 }
 0x57e   :  { %p1160_p7 = scmp.ne.s32.totalorder %s835_s25, %s1159_s28  ;;  %p1165_p9 = scmp.lt.s32.totalorder %s1159_s28, %s1159_s28 }
 0x580   :  { %p1166_p10 = por %p1165_p9, %p1164_p8 }
 0x582   :  { %p1167_p11 = pnand %p1166_p10, %p1160_p7 }
 0x634   :  { %v737_v10 = vpop.f32.mrb[6].mxu0 }
 0x635   :  { %v808_v35 = vadd.f32 %v1425_v39, %v737_v10  ;;  %v1007_v36 = vpop.f32.mrb[7].mxu0 }
 0x637   :  { %v815_v37 = vadd.f32 %v889_v34, %v808_v35 }
 0x639   :  { %817 = vst.msk [vmem:[#allocation5] sm:$0x3] %vm816_vm6, %v815_v37 }
 0x63a   :  { %1170 = shalt.err (!%p1167_p11)
}
 0x63b   :  { %s1171_s9 = scalar_lea.hbm %s1504_s10, 32 }
 0x63c   :  { %p1172_p12 = scmp.ne.s32.totalorder %s1504_s10, %s1171_s9  ;;  %p1175_p13 = scmp.lt.u32.totalorder %s1171_s9, %s1504_s10 }
 0x63e   :  { %p1177_p0 = pnand %p1175_p13, %p1172_p12 }
 0x640   :  { %1180 = shalt.err (!%p1177_p0)
}
 0x641   :  { %837 = dma.vmem_to_hbm [thread:$0]  %s835_s25, 32, %s1504_s10, [#allocation3]  }
 0x642   :  { %1183 = dma.done.wait [#allocation3], 32  }
 0x643   :  { %1184 = vsyncadd [#allocation3], 4294967264 }
 0x644   :  { %1185 = dma.done.wait [#allocation7], 64  }
 0x645   :  { %1186 = vsyncadd [#allocation7], 4294967232 }
 0x646   :  { %871 = vsyncpa [#allocation3], 1 }
 0x647   :  { %872 = vsyncpa [#allocation7], 1 }
 0x648   :  { %873 = vsyncpa [#allocation4], 1 }

</bundles_post_ra>
